<compile_context>
chip_gen: v5e
topology: v5e:2x2
jax: 0.10.0
libtpu: 0.0.40
codegen_flags: <defaults>
</compile_context>

<pallas_src>
import functools

import numpy as np
import jax
import jax.numpy as jnp
from jax.experimental import pallas as pl
from jax.experimental.pallas import tpu as pltpu


def _round_up(x, m):
    return (x + m - 1) // m * m


def _conv_stats_kernel(p_ref, w_ref, b_ref, y_ref, stats_ref, *, m_total, tile_m):
    """Pass 1: stride-2 conv as one deep-K matmul (+bias) per tile, plus BN partials.

    p_ref:     (tile_m, K)         bf16 im2col patches, K = 9*Cin (taps folded into K)
    w_ref:     (K, Cout_pad)       bf16 weights
    b_ref:     (1, Cout_pad)       f32 conv bias
    y_ref:     (tile_m, Cout_pad)  f32 conv + bias tile
    stats_ref: (1, 2, Cout_pad)    f32 [sum, sum_of_squares] over valid rows of tile
    """
    i = pl.program_id(0)

    acc = jnp.dot(p_ref[...], w_ref[...], preferred_element_type=jnp.float32)
    acc = acc + b_ref[...]
    y_ref[...] = acc

    # Mask padded rows (M padded up to a multiple of tile_m) out of the BN stats.
    row = i * tile_m + jax.lax.broadcasted_iota(jnp.int32, (tile_m, 1), 0)
    valid = row < m_total
    am = jnp.where(valid, acc, 0.0)
    s = jnp.sum(am, axis=0, keepdims=True)         # (1, Cout_pad)
    sq = jnp.sum(am * acc, axis=0, keepdims=True)  # masked sum of squares
    stats_ref[...] = jnp.concatenate([s, sq], axis=0)[None]


def _bn_relu_kernel(y_ref, scale_ref, shift_ref, o_ref):
    """Pass 2: fused BN-affine (precomputed scale/shift) + ReLU per tile."""
    o_ref[...] = jnp.maximum(y_ref[...] * scale_ref[...] + shift_ref[...], 0.0)


def down_forward(x_nchw, w, bias, gamma, beta, *, eps=1e-5, tile_m=512):
    """Forward of `Down`.

    x_nchw: (N, Cin, H, W) f32
    w:      (Cout, Cin, 3, 3)  Conv2d weight (PyTorch layout)
    bias, gamma, beta: (Cout,)
    returns (N, Cout, ceil(H/2), ceil(W/2)) f32 (NCHW, matching PyTorch)
    """
    N, cin, H, W = x_nchw.shape
    cout = w.shape[0]
    Ho = (H - 1) // 2 + 1
    Wo = (W - 1) // 2 + 1
    M = N * Ho * Wo
    K = 9 * cin
    cout_pad = _round_up(cout, 128)
    tile_m = min(tile_m, _round_up(M, 8))
    m_pad = _round_up(M, tile_m)
    num_tiles = m_pad // tile_m

    # ---- glue (plain JAX): NHWC, pad=1, strided im2col with taps folded into K ----
    x = jnp.transpose(x_nchw, (0, 2, 3, 1))                       # NHWC
    x_pad = jnp.pad(x, ((0, 0), (1, 1), (1, 1), (0, 0)))
    taps = []
    for ky in range(3):
        for kx in range(3):
            taps.append(jax.lax.slice(
                x_pad,
                (0, ky, kx, 0),
                (N, ky + 2 * (Ho - 1) + 1, kx + 2 * (Wo - 1) + 1, cin),
                (1, 2, 2, 1)))                                    # (N, Ho, Wo, Cin)
    patches = jnp.concatenate(taps, axis=-1).reshape(M, K)        # (M, 9*Cin)
    patches = jnp.pad(patches, ((0, m_pad - M), (0, 0))).astype(jnp.bfloat16)

    # Conv2d weight -> (ky, kx, ci, co) flattened to (9*Cin, Cout_pad), lane-padded.
    w_flat = jnp.transpose(w, (2, 3, 1, 0)).reshape(K, cout)
    w_flat = jnp.pad(w_flat, ((0, 0), (0, cout_pad - cout))).astype(jnp.bfloat16)
    bias_p = jnp.pad(bias, (0, cout_pad - cout)).astype(jnp.float32).reshape(1, cout_pad)
    gamma_p = jnp.pad(gamma, (0, cout_pad - cout)).astype(jnp.float32)
    beta_p = jnp.pad(beta, (0, cout_pad - cout)).astype(jnp.float32)

    cparams = pltpu.CompilerParams(
        dimension_semantics=("parallel",),
        vmem_limit_bytes=32 * 1024 * 1024)

    # ---- pass 1: conv + bias tiles, per-tile BN partial sums ----
    conv, stats = pl.pallas_call(
        functools.partial(_conv_stats_kernel, m_total=M, tile_m=tile_m),
        out_shape=(jax.ShapeDtypeStruct((m_pad, cout_pad), jnp.float32),
                   jax.ShapeDtypeStruct((num_tiles, 2, cout_pad), jnp.float32)),
        grid=(num_tiles,),
        in_specs=[pl.BlockSpec((tile_m, K), lambda i: (i, 0)),
                  pl.BlockSpec((K, cout_pad), lambda i: (0, 0)),
                  pl.BlockSpec((1, cout_pad), lambda i: (0, 0))],
        out_specs=(pl.BlockSpec((tile_m, cout_pad), lambda i: (i, 0)),
                   pl.BlockSpec((1, 2, cout_pad), lambda i: (i, 0, 0))),
        compiler_params=cparams,
    )(patches, w_flat, bias_p)

    # ---- tiny glue: exact global BN stats (training mode, biased var) ----
    sums = jnp.sum(stats, axis=0)                       # (2, Cout_pad)
    mean = sums[0] / M
    var = jnp.maximum(sums[1] / M - mean * mean, 0.0)
    scale = gamma_p * jax.lax.rsqrt(var + eps)
    shift = beta_p - mean * scale

    # ---- pass 2: fused scale/shift + ReLU ----
    out_flat = pl.pallas_call(
        _bn_relu_kernel,
        out_shape=jax.ShapeDtypeStruct((m_pad, cout_pad), jnp.float32),
        grid=(num_tiles,),
        in_specs=[pl.BlockSpec((tile_m, cout_pad), lambda i: (i, 0)),
                  pl.BlockSpec((1, cout_pad), lambda i: (0, 0)),
                  pl.BlockSpec((1, cout_pad), lambda i: (0, 0))],
        out_specs=pl.BlockSpec((tile_m, cout_pad), lambda i: (i, 0)),
        compiler_params=cparams,
    )(conv, scale.reshape(1, cout_pad), shift.reshape(1, cout_pad))

    out = out_flat[:M, :cout].reshape(N, Ho, Wo, cout)
    return jnp.transpose(out, (0, 3, 1, 2))                       # back to NCHW


def _reference_down(x, w, bias, gamma, beta, eps=1e-5):
    """Independent numpy reference: Conv2d(s=2, p=1) + BatchNorm2d(train) + ReLU."""
    x = np.asarray(x, np.float64)
    w = np.asarray(w, np.float64)
    bias = np.asarray(bias, np.float64)
    gamma = np.asarray(gamma, np.float64)
    beta = np.asarray(beta, np.float64)
    N, cin, H, W = x.shape
    cout = w.shape[0]
    Ho = (H - 1) // 2 + 1
    Wo = (W - 1) // 2 + 1
    xp = np.pad(x, ((0, 0), (0, 0), (1, 1), (1, 1)))
    y = np.zeros((N, cout, Ho, Wo), np.float64)
    for ky in range(3):
        for kx in range(3):
            xs = xp[:, :, ky:ky + 2 * (Ho - 1) + 1:2, kx:kx + 2 * (Wo - 1) + 1:2]
            y += np.einsum('nchw,oc->nohw', xs, w[:, :, ky, kx])
    y += bias[None, :, None, None]
    mean = y.mean(axis=(0, 2, 3), keepdims=True)
    var = y.var(axis=(0, 2, 3), keepdims=True)        # biased, as in BN training
    yn = (y - mean) / np.sqrt(var + eps)
    yn = yn * gamma[None, :, None, None] + beta[None, :, None, None]
    return np.maximum(yn, 0.0)


if __name__ == "__main__":
    def _bf16(a):  # model the kernel's bf16 MXU operands in the reference
        return np.asarray(jnp.asarray(a).astype(jnp.bfloat16).astype(jnp.float32))

    fwd = jax.jit(down_forward)
    key = jax.random.PRNGKey(0)
    # Second shape forces multiple M tiles + row masking of the BN partials.
    for (N, Cin, Cout, H, W) in [(2, 4, 8, 16, 16), (2, 4, 8, 40, 40)]:
        key, k1, k2, k3, k4, k5 = jax.random.split(key, 6)
        x = jax.random.normal(k1, (N, Cin, H, W), jnp.float32)
        w = jax.random.normal(k2, (Cout, Cin, 3, 3), jnp.float32) * 0.2
        bias = jax.random.normal(k3, (Cout,), jnp.float32) * 0.1
        gamma = 1.0 + 0.1 * jax.random.normal(k4, (Cout,), jnp.float32)
        beta = 0.1 * jax.random.normal(k5, (Cout,), jnp.float32)

        out = jax.block_until_ready(fwd(x, w, bias, gamma, beta))
        Ho, Wo = (H - 1) // 2 + 1, (W - 1) // 2 + 1
        assert out.shape == (N, Cout, Ho, Wo), out.shape

        ref = _reference_down(_bf16(x), _bf16(w), bias, gamma, beta)
        np.testing.assert_allclose(np.asarray(out), ref, rtol=2e-3, atol=2e-3)

    print("KERNEL_OK")
</pallas_src>

<mosaic_0001>
module attributes {stable_mosaic.version = 11 : i64} {
  func.func @_conv_stats_kernel(%arg0: i32, %arg1: memref<128x36xbf16, #tpu.memory_space<vmem>>, %arg2: memref<36x128xbf16, #tpu.memory_space<vmem>>, %arg3: memref<1x128xf32, #tpu.memory_space<vmem>>, %arg4: memref<128x128xf32, #tpu.memory_space<vmem>>, %arg5: memref<1x2x128xf32, #tpu.memory_space<vmem>>) attributes {dimension_semantics = [#tpu.dimension_semantics<parallel>], iteration_bounds = array<i64: 1>, scalar_prefetch = 0 : i64, scratch_operands = 0 : i64, tpu.core_type = #tpu.core_type<tc>, window_params = [{transform_indices = @transform_0, window_bounds = array<i64: 128, 36>}, {pipeline_mode = #tpu.pipeline_mode<synchronous>, transform_indices = @transform_1, window_bounds = array<i64: 36, 128>}, {pipeline_mode = #tpu.pipeline_mode<synchronous>, transform_indices = @transform_2, window_bounds = array<i64: 1, 128>}, {transform_indices = @transform_3, window_bounds = array<i64: 128, 128>}, {transform_indices = @transform_4, window_bounds = array<i64: 1, 2, 128>}]} {
    %c0 = arith.constant 0 : index
    %c0_0 = arith.constant 0 : index
    %0 = vector.load %arg1[%c0, %c0_0] : memref<128x36xbf16, #tpu.memory_space<vmem>>, vector<128x36xbf16>
    %c0_1 = arith.constant 0 : index
    %c0_2 = arith.constant 0 : index
    %1 = vector.load %arg2[%c0_1, %c0_2] : memref<36x128xbf16, #tpu.memory_space<vmem>>, vector<36x128xbf16>
    %cst = arith.constant dense<0.000000e+00> : vector<128x128xf32>
    %2 = tpu.matmul %0, %1, %cst {dimension_numbers = #tpu.dot_dimension_numbers<[1], [0], [0], [1], [0, 0, 1, 1], [], []>} : vector<128x36xbf16>, vector<36x128xbf16>, vector<128x128xf32> -> vector<128x128xf32>
    %c0_3 = arith.constant 0 : index
    %c0_4 = arith.constant 0 : index
    %3 = vector.load %arg3[%c0_3, %c0_4] : memref<1x128xf32, #tpu.memory_space<vmem>>, vector<1x128xf32>
    %4 = vector.broadcast %3 : vector<1x128xf32> to vector<128x128xf32>
    %5 = arith.addf %2, %4 : vector<128x128xf32>
    %c0_5 = arith.constant 0 : index
    %c0_6 = arith.constant 0 : index
    %6 = vector.load %arg4[%c0_5, %c0_6] : memref<128x128xf32, #tpu.memory_space<vmem>>, vector<128x128xf32>
    tpu.vector_store %arg4[%c0_5, %c0_6], %5 {strides = array<i32>} : memref<128x128xf32, #tpu.memory_space<vmem>>, vector<128x128xf32>,
    %c128_i32 = arith.constant 128 : i32
    %7 = arith.muli %arg0, %c128_i32 : i32
    %8 = tpu.iota {dimensions = array<i32: 0>} : vector<128x1xi32>
    %9 = vector.broadcast %7 : i32 to vector<128x1xi32>
    %10 = arith.addi %9, %8 : vector<128x1xi32>
    %c128_i32_7 = arith.constant 128 : i32
    %11 = vector.broadcast %c128_i32_7 : i32 to vector<128x1xi32>
    %12 = arith.cmpi slt, %10, %11 : vector<128x1xi32>
    %cst_8 = arith.constant 0.000000e+00 : f32
    %13 = vector.shape_cast %12 : vector<128x1xi1> to vector<128x1xi1>
    %14 = vector.broadcast %13 : vector<128x1xi1> to vector<128x128xi1>
    %15 = vector.broadcast %cst_8 : f32 to vector<128x128xf32>
    %16 = arith.select %14, %5, %15 : vector<128x128xi1>, vector<128x128xf32>
    %cst_9 = arith.constant dense<0.000000e+00> : vector<128xf32>
    %17 = vector.multi_reduction <add>, %16, %cst_9 [0] : vector<128x128xf32> to vector<128xf32>
    %18 = vector.shape_cast %17 : vector<128xf32> to vector<1x128xf32>
    %19 = arith.mulf %16, %5 : vector<128x128xf32>
    %cst_10 = arith.constant dense<0.000000e+00> : vector<128xf32>
    %20 = vector.multi_reduction <add>, %19, %cst_10 [0] : vector<128x128xf32> to vector<128xf32>
    %21 = vector.shape_cast %20 : vector<128xf32> to vector<1x128xf32>
    %22 = tpu.concatenate %18, %21 in 0 : vector<1x128xf32>, vector<1x128xf32> -> vector<2x128xf32>
    %23 = vector.shape_cast %22 : vector<2x128xf32> to vector<1x2x128xf32>
    %c0_11 = arith.constant 0 : index
    %c0_12 = arith.constant 0 : index
    %c0_13 = arith.constant 0 : index
    %24 = vector.load %arg5[%c0_11, %c0_12, %c0_13] : memref<1x2x128xf32, #tpu.memory_space<vmem>>, vector<1x2x128xf32>
    tpu.vector_store %arg5[%c0_11, %c0_12, %c0_13], %23 {strides = array<i32>} : memref<1x2x128xf32, #tpu.memory_space<vmem>>, vector<1x2x128xf32>,
    return
  }
  func.func @transform_0(%arg0: i32) -> (i32, i32) {
    %c0_i32 = arith.constant 0 : i32
    %c0_i32_0 = arith.constant 0 : i32
    return %arg0, %c0_i32 : i32, i32
  }
  func.func @transform_1(%arg0: i32) -> (i32, i32) {
    %c0_i32 = arith.constant 0 : i32
    %c0_i32_0 = arith.constant 0 : i32
    %c0_i32_1 = arith.constant 0 : i32
    return %c0_i32, %c0_i32_0 : i32, i32
  }
  func.func @transform_2(%arg0: i32) -> (i32, i32) {
    %c0_i32 = arith.constant 0 : i32
    %c0_i32_0 = arith.constant 0 : i32
    %c0_i32_1 = arith.constant 0 : i32
    return %c0_i32, %c0_i32_0 : i32, i32
  }
  func.func @transform_3(%arg0: i32) -> (i32, i32) {
    %c0_i32 = arith.constant 0 : i32
    %c0_i32_0 = arith.constant 0 : i32
    return %arg0, %c0_i32 : i32, i32
  }
  func.func @transform_4(%arg0: i32) -> (i32, i32, i32) {
    %c0_i32 = arith.constant 0 : i32
    %c0_i32_0 = arith.constant 0 : i32
    %c0_i32_1 = arith.constant 0 : i32
    return %arg0, %c0_i32, %c0_i32_0 : i32, i32, i32
  }
}

module attributes {stable_mosaic.version = 11 : i64} {
  func.func @_bn_relu_kernel(%arg0: i32, %arg1: memref<128x128xf32, #tpu.memory_space<vmem>>, %arg2: memref<1x128xf32, #tpu.memory_space<vmem>>, %arg3: memref<1x128xf32, #tpu.memory_space<vmem>>, %arg4: memref<128x128xf32, #tpu.memory_space<vmem>>) attributes {dimension_semantics = [#tpu.dimension_semantics<parallel>], iteration_bounds = array<i64: 1>, scalar_prefetch = 0 : i64, scratch_operands = 0 : i64, tpu.core_type = #tpu.core_type<tc>, window_params = [{transform_indices = @transform_0, window_bounds = array<i64: 128, 128>}, {pipeline_mode = #tpu.pipeline_mode<synchronous>, transform_indices = @transform_1, window_bounds = array<i64: 1, 128>}, {pipeline_mode = #tpu.pipeline_mode<synchronous>, transform_indices = @transform_2, window_bounds = array<i64: 1, 128>}, {transform_indices = @transform_3, window_bounds = array<i64: 128, 128>}]} {
    %c0 = arith.constant 0 : index
    %c0_0 = arith.constant 0 : index
    %0 = vector.load %arg1[%c0, %c0_0] : memref<128x128xf32, #tpu.memory_space<vmem>>, vector<128x128xf32>
    %c0_1 = arith.constant 0 : index
    %c0_2 = arith.constant 0 : index
    %1 = vector.load %arg2[%c0_1, %c0_2] : memref<1x128xf32, #tpu.memory_space<vmem>>, vector<1x128xf32>
    %2 = vector.broadcast %1 : vector<1x128xf32> to vector<128x128xf32>
    %3 = arith.mulf %0, %2 : vector<128x128xf32>
    %c0_3 = arith.constant 0 : index
    %c0_4 = arith.constant 0 : index
    %4 = vector.load %arg3[%c0_3, %c0_4] : memref<1x128xf32, #tpu.memory_space<vmem>>, vector<1x128xf32>
    %5 = vector.broadcast %4 : vector<1x128xf32> to vector<128x128xf32>
    %6 = arith.addf %3, %5 : vector<128x128xf32>
    %cst = arith.constant 0.000000e+00 : f32
    %7 = vector.broadcast %cst : f32 to vector<128x128xf32>
    %8 = arith.maximumf %6, %7 : vector<128x128xf32>
    %c0_5 = arith.constant 0 : index
    %c0_6 = arith.constant 0 : index
    %9 = vector.load %arg4[%c0_5, %c0_6] : memref<128x128xf32, #tpu.memory_space<vmem>>, vector<128x128xf32>
    tpu.vector_store %arg4[%c0_5, %c0_6], %8 {strides = array<i32>} : memref<128x128xf32, #tpu.memory_space<vmem>>, vector<128x128xf32>,
    return
  }
  func.func @transform_0(%arg0: i32) -> (i32, i32) {
    %c0_i32 = arith.constant 0 : i32
    %c0_i32_0 = arith.constant 0 : i32
    return %arg0, %c0_i32 : i32, i32
  }
  func.func @transform_1(%arg0: i32) -> (i32, i32) {
    %c0_i32 = arith.constant 0 : i32
    %c0_i32_0 = arith.constant 0 : i32
    %c0_i32_1 = arith.constant 0 : i32
    return %c0_i32, %c0_i32_0 : i32, i32
  }
  func.func @transform_2(%arg0: i32) -> (i32, i32) {
    %c0_i32 = arith.constant 0 : i32
    %c0_i32_0 = arith.constant 0 : i32
    %c0_i32_1 = arith.constant 0 : i32
    return %c0_i32, %c0_i32_0 : i32, i32
  }
  func.func @transform_3(%arg0: i32) -> (i32, i32) {
    %c0_i32 = arith.constant 0 : i32
    %c0_i32_0 = arith.constant 0 : i32
    return %arg0, %c0_i32 : i32, i32
  }
}

</mosaic_0001>

<bundles_post_ra>
// kernel: down_forward.3
= control target key start
LH: loop header
LB: loop body
LE: loop exit
PB: predicated region body
PF: predicated region fallthrough
CT: control target
= control target key end

     0   :  { %s248_s0 = inlined_call_operand.vmem [shape: f32[128,128], index: 0, kind: input, shape index: {}]   ;;  %s249_s1 = inlined_call_operand.vmem [shape: f32[1,128], index: 1, kind: input, shape index: {}]   ;;  %s250_s2 = inlined_call_operand.vmem [shape: f32[1,128], index: 2, kind: input, shape index: {}]   ;;  %s251_s3 = inlined_call_operand.vmem [shape: f32[128,128], index: 3, kind: output, shape index: {}]  }
   0x1   :  { %v14_v0 = vld [vmem:[%s248_s0] sm:$0xff]  ;;  %v15_v3 = vld [vmem:[%s248_s0 + $0x8] sm:$0xff]  ;;  %v16_v6 = vld [vmem:[%s248_s0 + $0x10] sm:$0xff] }
   0x2   :  { %v106_v1 = vld [vmem:[%s249_s1] ss:$0 sm:$0xff]  ;;  %v17_v7 = vld [vmem:[%s248_s0 + $0x18] sm:$0xff]  ;;  %v19_v12 = vld [vmem:[%s248_s0 + $0x28] sm:$0xff] }
   0x3   :  { %v137_v2 = vld [vmem:[%s250_s2] ss:$0 sm:$0xff]  ;;  %v34_v4 = vmul.f32 %v106_v1, %v14_v0  ;;  %v35_v5 = vmul.f32 %v106_v1, %v15_v3  ;;  %v36_v9 = vmul.f32 %v106_v1, %v16_v6  ;;  %v37_v10 = vmul.f32 %v106_v1, %v17_v7  ;;  %v20_v13 = vld [vmem:[%s248_s0 + $0x30] sm:$0xff]  ;;  %v21_v14 = vld [vmem:[%s248_s0 + $0x38] sm:$0xff] }
   0x4   :  { %v18_v8 = vld [vmem:[%s248_s0 + $0x20] sm:$0xff]  ;;  %v39_v17 = vmul.f32 %v106_v1, %v19_v12  ;;  %v40_v18 = vmul.f32 %v106_v1, %v20_v13  ;;  %v41_v22 = vmul.f32 %v106_v1, %v21_v14  ;;  %v23_v24 = vld [vmem:[%s248_s0 + $0x48] sm:$0xff]  ;;  %v24_v29 = vld [vmem:[%s248_s0 + $0x50] sm:$0xff] }
   0x5   :  { %v38_v11 = vmul.f32 %v106_v1, %v18_v8  ;;  %v54_v15 = vadd.f32 %v137_v2, %v34_v4  ;;  %v55_v16 = vadd.f32 %v137_v2, %v35_v5  ;;  %v56_v19 = vadd.f32 %v137_v2, %v36_v9  ;;  %v22_v23 = vld [vmem:[%s248_s0 + $0x40] sm:$0xff]  ;;  %v25_v30 = vld [vmem:[%s248_s0 + $0x58] sm:$0xff]  ;;  %v27_v35 = vld [vmem:[%s248_s0 + $0x68] sm:$0xff] }
   0x6   :  { %v57_v20 = vadd.f32 %v137_v2, %v37_v10  ;;  %v59_v27 = vadd.f32 %v137_v2, %v39_v17  ;;  %v60_v28 = vadd.f32 %v137_v2, %v40_v18  ;;  %v26_v31 = vld [vmem:[%s248_s0 + $0x60] sm:$0xff]  ;;  %v61_v34 = vadd.f32 %v137_v2, %v41_v22  ;;  %v28_v36 = vld [vmem:[%s248_s0 + $0x70] sm:$0xff]  ;;  %v29_v41 = vld [vmem:[%s248_s0 + $0x78] sm:$0xff] }
   0x7   :  { %v58_v21 = vadd.f32 %v137_v2, %v38_v11  ;;  %v70_v25 = vmax.f32 %v54_v15, 0.0  ;;  %v71_v26 = vmax.f32 %v55_v16, 0.0  ;;  %v72_v32 = vmax.f32 %v56_v19, 0.0 }
   0x8   :  { %v73_v33 = vmax.f32 %v57_v20, 0.0  ;;  %v75_v38 = vmax.f32 %v59_v27, 0.0  ;;  %v42_v39 = vmul.f32 %v106_v1, %v22_v23  ;;  %v43_v40 = vmul.f32 %v106_v1, %v23_v24 }
   0x9   :  { %86 = vst [vmem:[%s251_s3] sm:$0xff] %v70_v25  ;;  %v74_v37 = vmax.f32 %v58_v21, 0.0  ;;  %v76_v42 = vmax.f32 %v60_v28, 0.0  ;;  %v44_v43 = vmul.f32 %v106_v1, %v24_v29  ;;  %v45_v44 = vmul.f32 %v106_v1, %v25_v30 }
   0xa   :  { %87 = vst [vmem:[%s251_s3 + $0x8] sm:$0xff] %v71_v26  ;;  %v46_v45 = vmul.f32 %v106_v1, %v26_v31  ;;  %v62_v46 = vadd.f32 %v137_v2, %v42_v39  ;;  %v63_v47 = vadd.f32 %v137_v2, %v43_v40  ;;  %v47_v48 = vmul.f32 %v106_v1, %v27_v35 }
   0xb   :  { %88 = vst [vmem:[%s251_s3 + $0x10] sm:$0xff] %v72_v32  ;;  %v48_v49 = vmul.f32 %v106_v1, %v28_v36  ;;  %v77_v50 = vmax.f32 %v61_v34, 0.0  ;;  %v64_v51 = vadd.f32 %v137_v2, %v44_v43  ;;  %v65_v52 = vadd.f32 %v137_v2, %v45_v44 }
   0xc   :  { %89 = vst [vmem:[%s251_s3 + $0x18] sm:$0xff] %v73_v33  ;;  %v49_v53 = vmul.f32 %v106_v1, %v29_v41  ;;  %v78_v54 = vmax.f32 %v62_v46, 0.0  ;;  %v66_v55 = vadd.f32 %v137_v2, %v46_v45  ;;  %v79_v56 = vmax.f32 %v63_v47, 0.0 }
   0xd   :  { %90 = vst [vmem:[%s251_s3 + $0x20] sm:$0xff] %v74_v37  ;;  %v67_v57 = vadd.f32 %v137_v2, %v47_v48  ;;  %v80_v58 = vmax.f32 %v64_v51, 0.0  ;;  %v68_v59 = vadd.f32 %v137_v2, %v48_v49  ;;  %v81_v60 = vmax.f32 %v65_v52, 0.0 }
   0xe   :  { %91 = vst [vmem:[%s251_s3 + $0x28] sm:$0xff] %v75_v38  ;;  %v69_v61 = vadd.f32 %v137_v2, %v49_v53  ;;  %v82_v62 = vmax.f32 %v66_v55, 0.0 }
   0xf   :  { %92 = vst [vmem:[%s251_s3 + $0x30] sm:$0xff] %v76_v42  ;;  %v83_v63 = vmax.f32 %v67_v57, 0.0  ;;  %v84_v0 = vmax.f32 %v68_v59, 0.0 }
  0x10   :  { %93 = vst [vmem:[%s251_s3 + $0x38] sm:$0xff] %v77_v50  ;;  %v85_v1 = vmax.f32 %v69_v61, 0.0 }
  0x11   :  { %94 = vst [vmem:[%s251_s3 + $0x40] sm:$0xff] %v78_v54 }
  0x12   :  { %95 = vst [vmem:[%s251_s3 + $0x48] sm:$0xff] %v79_v56 }
  0x13   :  { %96 = vst [vmem:[%s251_s3 + $0x50] sm:$0xff] %v80_v58 }
  0x14   :  { %97 = vst [vmem:[%s251_s3 + $0x58] sm:$0xff] %v81_v60 }
  0x15   :  { %98 = vst [vmem:[%s251_s3 + $0x60] sm:$0xff] %v82_v62 }
  0x16   :  { %99 = vst [vmem:[%s251_s3 + $0x68] sm:$0xff] %v83_v63 }
  0x17   :  { %100 = vst [vmem:[%s251_s3 + $0x70] sm:$0xff] %v84_v0 }
  0x18   :  { %101 = vst [vmem:[%s251_s3 + $0x78] sm:$0xff] %v85_v1 }

// kernel: down_forward.2
= control target key start
LH: loop header
LB: loop body
LE: loop exit
PB: predicated region body
PF: predicated region fallthrough
CT: control target
= control target key end

     0   :  { %vm122_vm0 = vcmask 1041408   ;;  %vm97_vm1 = vcmask 293888   ;;  %vm348_vm2 = vcmask 1040384   ;;  %s553_s1 = inlined_call_operand.vmem [shape: bf16[36,128], index: 1, kind: input, shape index: {}]   ;;  %s554_s2 = inlined_call_operand.vmem [shape: f32[1,128], index: 2, kind: input, shape index: {}]   ;;  %s555_s0 = inlined_call_operand.vmem [shape: bf16[128,36], index: 0, kind: input, shape index: {}]   ;;  %s556_s3 = inlined_call_operand.vmem [shape: f32[128,128], index: 3, kind: output, shape index: {0}]   ;;  %s557_s4 = inlined_call_operand.vmem [shape: f32[1,2,128], index: 4, kind: output, shape index: {1}]  }
   0x1   :  { %v37_v0 = vld [vmem:[%s553_s1 + $0x10] sm:$0x3]  ;;  %v416_v4 = vld [vmem:[%s553_s1 + $0x8] sm:$0xff]  ;;  %v415_v5 = vld [vmem:[%s553_s1] sm:$0xff] }
   0x2   :  { %v91_v1 = vunpack.c.l.b16 %v37_v0  ;;  %v407_v6 = vld [vmem:[%s555_s0] sm:$0xff]  ;;  %v409_v7 = vld [vmem:[%s555_s0 + $0x10] sm:$0xff]  ;;  %v408_v10 = vld [vmem:[%s555_s0 + $0x8] sm:$0xff] }
   0x3   :  { %v411_v8 = vld [vmem:[%s555_s0 + $0x20] sm:$0xff]  ;;  %v413_v9 = vld [vmem:[%s555_s0 + $0x30] sm:$0xff]  ;;  %v410_v11 = vld [vmem:[%s555_s0 + $0x18] sm:$0xff] }
   0x4   :  { %v94_v2 = vpack.c.b16 %v91_v1, %v91_v1  ;;  %v412_v12 = vld [vmem:[%s555_s0 + $0x28] sm:$0xff]  ;;  %v414_v13 = vld [vmem:[%s555_s0 + $0x38] sm:$0xff]  ;;  %v426_v14 = vld [vmem:[%s554_s2] ss:$0 sm:$0xff] }
   0x6   :  { %v124_v3 = vsel %vm122_vm0, %v94_v2, 0 }
   0x7   :  { %131 = vmatpush.bf16.msra.mxu0 %v124_v3  ;;  %417 = vmatpush.bf16.msra.mxu1 %v124_v3 }
   0x8   :  { %418 = vmatpush.bf16.msra.mxu2 %v124_v3  ;;  %419 = vmatpush.bf16.msra.mxu3 %v124_v3 }
   0xb   :  { %132 = vmatpush.bf16.msra.mxu0 %v416_v4  ;;  %420 = vmatpush.bf16.msra.mxu1 %v416_v4 }
   0xc   :  { %421 = vmatpush.bf16.msra.mxu2 %v416_v4  ;;  %422 = vmatpush.bf16.msra.mxu3 %v416_v4 }
   0xf   :  { %133 = vmatpush.bf16.msra.mxu0 %v415_v5  ;;  %423 = vmatpush.bf16.msra.mxu1 %v415_v5 }
  0x10   :  { %424 = vmatpush.bf16.msra.mxu2 %v415_v5  ;;  %425 = vmatpush.bf16.msra.mxu3 %v415_v5 }
  0x12   :  { %399 = vmatmul.msk.bf16.vlgmr.msra.gmra.mxu0 %vm97_vm1, %v407_v6  ;;  %401 = vmatmul.msk.bf16.vlgmr.msra.gmra.mxu1 %vm97_vm1, %v409_v7 }
  0x13   :  { %403 = vmatmul.msk.bf16.vlgmr.msra.gmra.mxu2 %vm97_vm1, %v411_v8  ;;  %405 = vmatmul.msk.bf16.vlgmr.msra.gmra.mxu3 %vm97_vm1, %v413_v9 }
  0x22   :  { %400 = vmatmul.msk.bf16.gmra.mxu0 %vm97_vm1, %v408_v10  ;;  %402 = vmatmul.msk.bf16.gmra.mxu1 %vm97_vm1, %v410_v11 }
  0x23   :  { %404 = vmatmul.msk.bf16.gmra.mxu2 %vm97_vm1, %v412_v12  ;;  %406 = vmatmul.msk.bf16.gmra.mxu3 %vm97_vm1, %v414_v13 }
  0x8f   :  { %v135_v15 = vpop.f32.mrf.mxu0  ;;  %v145_v16 = vpop.f32.mrf.mxu1 }
  0x90   :  { %v136_v17 = vadd.f32 %v426_v14, %v135_v15  ;;  %v146_v18 = vadd.f32 %v426_v14, %v145_v16 }
  0x92   :  { %175 = vst [vmem:[%s556_s3] sm:$0xff] %v136_v17  ;;  %v311_v36 = vmul.f32 %v136_v17, %v136_v17  ;;  %v315_v52 = vmul.f32 %v146_v18, %v146_v18 }
  0x93   :  { %179 = vst [vmem:[%s556_s3 + $0x20] sm:$0xff] %v146_v18 }
  0x96   :  { %v155_v19 = vpop.f32.mrf.mxu2  ;;  %v165_v20 = vpop.f32.mrf.mxu3 }
  0x97   :  { %v137_v21 = vpop.f32.mrf.mxu0  ;;  %v147_v22 = vpop.f32.mrf.mxu1  ;;  %v156_v23 = vadd.f32 %v426_v14, %v155_v19  ;;  %v502_v26 = vadd.f32 %v426_v14, %v165_v20 }
  0x98   :  { %v138_v24 = vadd.f32 %v426_v14, %v137_v21  ;;  %v148_v25 = vadd.f32 %v426_v14, %v147_v22 }
  0x99   :  { %183 = vst [vmem:[%s556_s3 + $0x40] sm:$0xff] %v156_v23  ;;  %v319_v4 = vmul.f32 %v156_v23, %v156_v23  ;;  %v323_v16 = vmul.f32 %v502_v26, %v502_v26 }
  0x9a   :  { %176 = vst [vmem:[%s556_s3 + $0x8] sm:$0xff] %v138_v24  ;;  %v312_v35 = vmul.f32 %v138_v24, %v138_v24  ;;  %v290_v37 = vadd.f32 %v138_v24, %v136_v17  ;;  %v316_v55 = vmul.f32 %v148_v25, %v148_v25 }
  0x9b   :  { %180 = vst [vmem:[%s556_s3 + $0x28] sm:$0xff] %v148_v25 }
  0x9c   :  { %187 = vst [vmem:[%s556_s3 + $0x60] sm:$0xff] %v502_v26  ;;  %v327_v41 = vadd.f32 %v312_v35, %v311_v36 }
  0x9e   :  { %v157_v27 = vpop.f32.mrf.mxu2  ;;  %v167_v28 = vpop.f32.mrf.mxu3 }
  0x9f   :  { %v140_v29 = vpop.f32.mrf.mxu0  ;;  %v150_v30 = vpop.f32.mrf.mxu1  ;;  %v158_v31 = vadd.f32 %v426_v14, %v157_v27  ;;  %v168_v34 = vadd.f32 %v426_v14, %v167_v28 }
  0xa0   :  { %v141_v32 = vadd.f32 %v426_v14, %v140_v29  ;;  %v151_v33 = vadd.f32 %v426_v14, %v150_v30 }
  0xa1   :  { %184 = vst [vmem:[%s556_s3 + $0x48] sm:$0xff] %v158_v31  ;;  %v320_v7 = vmul.f32 %v158_v31, %v158_v31  ;;  %v324_v19 = vmul.f32 %v168_v34, %v168_v34 }
  0xa2   :  { %177 = vst [vmem:[%s556_s3 + $0x10] sm:$0xff] %v141_v32  ;;  %v313_v38 = vmul.f32 %v141_v32, %v141_v32  ;;  %v291_v45 = vadd.f32 %v290_v37, %v141_v32  ;;  %v317_v62 = vmul.f32 %v151_v33, %v151_v33 }
  0xa3   :  { %181 = vst [vmem:[%s556_s3 + $0x30] sm:$0xff] %v151_v33 }
  0xa4   :  { %188 = vst [vmem:[%s556_s3 + $0x68] sm:$0xff] %v168_v34  ;;  %v328_v49 = vadd.f32 %v327_v41, %v313_v38 }
  0xa6   :  { %v160_v39 = vpop.f32.mrf.mxu2  ;;  %v170_v40 = vpop.f32.mrf.mxu3 }
  0xa7   :  { %v142_v42 = vpop.f32.mrf.mxu0  ;;  %v152_v43 = vpop.f32.mrf.mxu1  ;;  %v161_v44 = vadd.f32 %v426_v14, %v160_v39  ;;  %v171_v48 = vadd.f32 %v426_v14, %v170_v40 }
  0xa8   :  { %v143_v46 = vadd.f32 %v426_v14, %v142_v42  ;;  %v153_v47 = vadd.f32 %v426_v14, %v152_v43 }
  0xa9   :  { %185 = vst [vmem:[%s556_s3 + $0x50] sm:$0xff] %v161_v44  ;;  %v321_v11 = vmul.f32 %v161_v44, %v161_v44 }
  0xaa   :  { %178 = vst [vmem:[%s556_s3 + $0x18] sm:$0xff] %v143_v46  ;;  %v292_v50 = vadd.f32 %v291_v45, %v143_v46  ;;  %v314_v51 = vmul.f32 %v143_v46, %v143_v46  ;;  %v318_v2 = vmul.f32 %v153_v47, %v153_v47 }
  0xab   :  { %182 = vst [vmem:[%s556_s3 + $0x38] sm:$0xff] %v153_v47 }
  0xac   :  { %v293_v53 = vadd.f32 %v292_v50, %v146_v18  ;;  %v329_v54 = vadd.f32 %v328_v49, %v314_v51  ;;  %189 = vst [vmem:[%s556_s3 + $0x70] sm:$0xff] %v171_v48 }
  0xae   :  { %v330_v56 = vadd.f32 %v329_v54, %v315_v52  ;;  %v294_v57 = vadd.f32 %v293_v53, %v148_v25  ;;  %v162_v58 = vpop.f32.mrf.mxu2  ;;  %v172_v59 = vpop.f32.mrf.mxu3 }
  0xaf   :  { %v163_v60 = vadd.f32 %v426_v14, %v162_v58  ;;  %v173_v61 = vadd.f32 %v426_v14, %v172_v59 }
  0xb0   :  { %v295_v63 = vadd.f32 %v294_v57, %v151_v33  ;;  %v331_v0 = vadd.f32 %v330_v56, %v316_v55 }
  0xb1   :  { %186 = vst [vmem:[%s556_s3 + $0x58] sm:$0xff] %v163_v60  ;;  %v322_v15 = vmul.f32 %v163_v60, %v163_v60  ;;  %v326_v28 = vmul.f32 %v173_v61, %v173_v61 }
  0xb2   :  { %v296_v1 = vadd.f32 %v295_v63, %v153_v47  ;;  %v332_v3 = vadd.f32 %v331_v0, %v317_v62  ;;  %190 = vst [vmem:[%s556_s3 + $0x78] sm:$0xff] %v173_v61 }
  0xb4   :  { %v297_v5 = vadd.f32 %v296_v1, %v156_v23  ;;  %v333_v6 = vadd.f32 %v332_v3, %v318_v2  ;;  %v325_v23 = vmul.f32 %v171_v48, %v171_v48 }
  0xb6   :  { %v334_v8 = vadd.f32 %v333_v6, %v319_v4  ;;  %v298_v9 = vadd.f32 %v297_v5, %v158_v31 }
  0xb8   :  { %v299_v10 = vadd.f32 %v298_v9, %v161_v44  ;;  %v335_v12 = vadd.f32 %v334_v8, %v320_v7 }
  0xba   :  { %v336_v13 = vadd.f32 %v335_v12, %v321_v11  ;;  %v300_v14 = vadd.f32 %v299_v10, %v163_v60 }
  0xbc   :  { %v301_v17 = vadd.f32 %v300_v14, %v502_v26  ;;  %v337_v18 = vadd.f32 %v336_v13, %v322_v15 }
  0xbe   :  { %v338_v20 = vadd.f32 %v337_v18, %v323_v16  ;;  %v302_v21 = vadd.f32 %v301_v17, %v168_v34 }
  0xc0   :  { %v303_v22 = vadd.f32 %v302_v21, %v171_v48  ;;  %v339_v24 = vadd.f32 %v338_v20, %v324_v19 }
  0xc2   :  { %v340_v25 = vadd.f32 %v339_v24, %v325_v23  ;;  %v304_v27 = vadd.f32 %v303_v22, %v173_v61 }
  0xc4   :  { %v305_v29 = vrot.slane %v304_v27, 4  ;;  %v341_v30 = vadd.f32 %v340_v25, %v326_v28 }
  0xc6   :  { %v306_v31 = vadd.f32 %v305_v29, %v304_v27  ;;  %v342_v32 = vrot.slane %v341_v30, 4 }
  0xc8   :  { %v307_v33 = vrot.slane %v306_v31, 2  ;;  %v343_v35 = vadd.f32 %v342_v32, %v341_v30 }
  0xca   :  { %v308_v36 = vadd.f32 %v307_v33, %v306_v31  ;;  %v344_v37 = vrot.slane %v343_v35, 2 }
  0xcc   :  { %v309_v38 = vrot.slane %v308_v36, 1  ;;  %v345_v26 = vadd.f32 %v344_v37, %v343_v35 }
  0xce   :  { %v346_v39 = vrot.slane %v345_v26, 1  ;;  %v310_v40 = vadd.f32 %v309_v38, %v308_v36 }
  0xd0   :  { %v347_v34 = vadd.f32 %v346_v39, %v345_v26 }
  0xd2   :  { %v349_v41 = vsel %vm348_vm2, %v310_v40, %v347_v34 }
  0xd3   :  { %350 = vst [vmem:[%s557_s4] sm:$0x3] %v349_v41 }

</bundles_post_ra>
